<compile_context>
chip_gen: v5e
topology: v5e:2x2
jax: 0.10.0
libtpu: 0.0.40
codegen_flags: <defaults>
</compile_context>

<pallas_src>
import functools

import jax
import jax.numpy as jnp
from jax.experimental import pallas as pl
from jax.experimental.pallas import tpu as pltpu

BN_EPS = 1e-5
LANE = 128  # classifier heads & add-encoder output are lane-padded to this width

_VMEM = pl.BlockSpec(memory_space=pltpu.MemorySpace.VMEM)
_COMPILER_PARAMS = pltpu.CompilerParams(vmem_limit_bytes=16 * 1024 * 1024)


# ---------------------------------------------------------------------------
# Kernel helpers
# ---------------------------------------------------------------------------
def _bn_relu(z, gamma, beta):
    """Train-mode BatchNorm1d (biased batch stats) + ReLU on a VMEM tile."""
    mu = jnp.mean(z, axis=0, keepdims=True)                   # (1, out)
    zc = z - mu
    var = jnp.mean(zc * zc, axis=0, keepdims=True)            # biased variance
    scale = jax.lax.rsqrt(var + BN_EPS) * gamma                # fold rsqrt*gamma once
    return jnp.maximum(zc * scale + beta, 0.0)


def _dot(a, w_ref):
    """f32 activation @ bf16 weight (cast up) with f32 accumulation."""
    return jnp.dot(a, w_ref[...].astype(jnp.float32),
                   preferred_element_type=jnp.float32)


# ---------------------------------------------------------------------------
# Fused kernels
# ---------------------------------------------------------------------------
def _tram_train_kernel(
    xf_ref, xadd_ref,
    enc_w_ref, enc_b_ref,
    base_w_ref, base_b_ref,          # lane-padded to (.., LANE)
    ae_w_ref, ae_g_ref, ae_bt_ref,   # lane-padded; linear bias dropped (BN cancels it)
    ap1_we_ref, ap1_wa_ref,          # split weights replace the concat
    ap_g_ref, ap_bt_ref,             # add_predictor layer-1 bias dropped (BN cancels it)
    ap2_w_ref, ap2_b_ref,            # lane-padded to (.., LANE)
    out_ref,                         # (B, 2*LANE): [:, :LANE]=base, [:, LANE:]=add
):
    # encoder: Linear + ReLU
    emb = jnp.maximum(_dot(xf_ref[...], enc_w_ref) + enc_b_ref[...], 0.0)

    # base_predictor (layer=0) on detached embedding (detach = forward no-op)
    base = _dot(emb, base_w_ref) + base_b_ref[...]

    # add_encoder (layer=1): Linear -> BN(train) -> ReLU (padded lanes stay 0)
    ae = _bn_relu(_dot(xadd_ref[...], ae_w_ref), ae_g_ref[...], ae_bt_ref[...])

    # add_predictor (layer=2): [emb | ae] @ W1 done as two dots, BN, ReLU, Linear
    z = _dot(emb, ap1_we_ref) + _dot(ae, ap1_wa_ref)
    h = _bn_relu(z, ap_g_ref[...], ap_bt_ref[...])
    add = _dot(h, ap2_w_ref) + ap2_b_ref[...]

    # lane-dense stores (both halves 128-lane aligned)
    out_ref[:, :LANE] = base
    out_ref[:, LANE:] = add


def _tram_infer_emb_kernel(
    xf_ref, enc_w_ref, enc_b_ref, base_w_ref, base_b_ref,
    emb_ref, base_ref,
):
    emb = jnp.maximum(_dot(xf_ref[...], enc_w_ref) + enc_b_ref[...], 0.0)
    emb_ref[...] = emb
    base_ref[...] = _dot(emb, base_w_ref) + base_b_ref[...]


def _tram_infer_kernel(
    xf_ref, enc_w_ref, enc_b_ref, base_w_ref, base_b_ref,
    base_ref,
):
    emb = jnp.maximum(_dot(xf_ref[...], enc_w_ref) + enc_b_ref[...], 0.0)
    base_ref[...] = _dot(emb, base_w_ref) + base_b_ref[...]


# ---------------------------------------------------------------------------
# Parameter init (PyTorch-equivalent shapes, weights stored transposed)
# ---------------------------------------------------------------------------
def init_tram_params(
    key,
    *,
    in_features,                 # C*H*W of the NCHW input
    add_input_dim=16,
    num_categories=2,
    base_predictor_input_dim=256,
    add_encoder_embed_dim=64,
    add_predictor_hidden_dim=128,
):
    def lin(k, fan_in, fan_out, scale=0.05):
        kw, kb = jax.random.split(k)
        w_t = scale * jax.random.normal(kw, (fan_in, fan_out), jnp.float32)
        b = scale * jax.random.normal(kb, (fan_out,), jnp.float32)
        return w_t, b

    keys = jax.random.split(key, 6)
    params = {}
    # encoder: Flatten -> Linear(in_features, base_predictor_input_dim) -> ReLU
    params["enc_w"], params["enc_b"] = lin(keys[0], in_features, base_predictor_input_dim)
    # base_predictor (layer=0)
    params["base_w"], params["base_b"] = lin(keys[1], base_predictor_input_dim, num_categories)
    # add_encoder (layer=1): Linear + BN + ReLU
    params["ae_w"], params["ae_b"] = lin(keys[2], add_input_dim, add_encoder_embed_dim)
    params["ae_gamma"] = jnp.ones((add_encoder_embed_dim,), jnp.float32)
    params["ae_beta"] = jnp.zeros((add_encoder_embed_dim,), jnp.float32)
    # add_predictor (layer=2): Linear + BN + ReLU ; Linear
    cat_dim = base_predictor_input_dim + add_encoder_embed_dim
    params["ap1_w"], params["ap1_b"] = lin(keys[3], cat_dim, add_predictor_hidden_dim)
    params["ap_gamma"] = jnp.ones((add_predictor_hidden_dim,), jnp.float32)
    params["ap_beta"] = jnp.zeros((add_predictor_hidden_dim,), jnp.float32)
    params["ap2_w"], params["ap2_b"] = lin(keys[4], add_predictor_hidden_dim, num_categories)
    return params


def prepare_tram_params(params, weights_dtype=jnp.bfloat16):
    """One-time weight prep: pad / split / reshape / bf16-cast (hoisted out of
    the jitted forward so no per-call XLA prep ops remain)."""
    emb_dim = params["enc_w"].shape[1]
    ae_dim = params["ae_w"].shape[1]
    wd = weights_dtype

    def pad_head(w_t, b):
        nc = w_t.shape[1]
        assert nc <= LANE, "num_categories must be <= 128 for the lane-padded head"
        return (jnp.pad(w_t, ((0, 0), (0, LANE - nc))),
                jnp.pad(b, (0, LANE - nc)).reshape(1, LANE))

    base_w, base_b = pad_head(params["base_w"], params["base_b"])
    ap2_w, ap2_b = pad_head(params["ap2_w"], params["ap2_b"])

    # add_encoder lane padding: padded BN columns have z=0, gamma=0, beta=0 ->
    # output exactly 0; zero-padded ap1_wa rows contribute nothing.
    ae_w = jnp.pad(params["ae_w"], ((0, 0), (0, LANE - ae_dim)))
    ae_g = jnp.pad(params["ae_gamma"], (0, LANE - ae_dim)).reshape(1, LANE)
    ae_bt = jnp.pad(params["ae_beta"], (0, LANE - ae_dim)).reshape(1, LANE)
    ap1_we = params["ap1_w"][:emb_dim, :]
    ap1_wa = jnp.pad(params["ap1_w"][emb_dim:, :], ((0, LANE - ae_dim), (0, 0)))

    # TODO(synk): a v7x dual-TensorCore batch grid would need a two-pass BN
    # (per-column sum/sumsq reduction); skipped at these tiny batch sizes.
    return {
        "enc_w": params["enc_w"].astype(wd),
        "enc_b": params["enc_b"].reshape(1, -1),
        "base_w": base_w.astype(wd), "base_b": base_b,
        "ae_w": ae_w.astype(wd), "ae_gamma": ae_g, "ae_beta": ae_bt,
        "ap1_we": ap1_we.astype(wd), "ap1_wa": ap1_wa.astype(wd),
        "ap_gamma": params["ap_gamma"].reshape(1, -1),
        "ap_beta": params["ap_beta"].reshape(1, -1),
        "ap2_w": ap2_w.astype(wd), "ap2_b": ap2_b,
    }


# ---------------------------------------------------------------------------
# Forward glue (prep dict is produced once by prepare_tram_params)
# ---------------------------------------------------------------------------
def tram_forward(prep, x, x_add=None, *, train=False, get_embedding=False,
                 num_categories=2):
    B = x.shape[0]
    x_flat = x.reshape(B, -1).astype(jnp.float32)              # NCHW -> (B, C*H*W)

    if train:
        if x_add is None:
            raise ValueError("train=True requires x_add")
        slab = pl.pallas_call(
            _tram_train_kernel,
            out_shape=jax.ShapeDtypeStruct((B, 2 * LANE), jnp.float32),
            in_specs=[_VMEM] * 15,
            out_specs=_VMEM,
            compiler_params=_COMPILER_PARAMS,
        )(
            x_flat, x_add.astype(jnp.float32),
            prep["enc_w"], prep["enc_b"],
            prep["base_w"], prep["base_b"],
            prep["ae_w"], prep["ae_gamma"], prep["ae_beta"],
            prep["ap1_we"], prep["ap1_wa"],
            prep["ap_gamma"], prep["ap_beta"],
            prep["ap2_w"], prep["ap2_b"],
        )
        return slab[:, :num_categories], slab[:, LANE:LANE + num_categories]

    emb_dim = prep["enc_w"].shape[1]
    if get_embedding:
        emb, base_pad = pl.pallas_call(
            _tram_infer_emb_kernel,
            out_shape=(jax.ShapeDtypeStruct((B, emb_dim), jnp.float32),
                       jax.ShapeDtypeStruct((B, LANE), jnp.float32)),
            in_specs=[_VMEM] * 5,
            out_specs=(_VMEM, _VMEM),
            compiler_params=_COMPILER_PARAMS,
        )(x_flat, prep["enc_w"], prep["enc_b"], prep["base_w"], prep["base_b"])
        return emb, base_pad[:, :num_categories]

    # eval without embedding: skip the (B, emb_dim) HBM writeback entirely
    base_pad = pl.pallas_call(
        _tram_infer_kernel,
        out_shape=jax.ShapeDtypeStruct((B, LANE), jnp.float32),
        in_specs=[_VMEM] * 5,
        out_specs=_VMEM,
        compiler_params=_COMPILER_PARAMS,
    )(x_flat, prep["enc_w"], prep["enc_b"], prep["base_w"], prep["base_b"])
    return base_pad[:, :num_categories]


# ---------------------------------------------------------------------------
# Pure-JAX reference (faithful to the PyTorch module, biases kept)
# ---------------------------------------------------------------------------
def _ref_bn_relu(z, g, bt):
    mu = z.mean(axis=0, keepdims=True)
    var = ((z - mu) ** 2).mean(axis=0, keepdims=True)
    return jnp.maximum((z - mu) / jnp.sqrt(var + BN_EPS) * g + bt, 0.0)


def tram_forward_ref(params, x, x_add):
    B = x.shape[0]
    xf = x.reshape(B, -1)
    emb = jnp.maximum(xf @ params["enc_w"] + params["enc_b"], 0.0)
    base = emb @ params["base_w"] + params["base_b"]
    ae = _ref_bn_relu(x_add @ params["ae_w"] + params["ae_b"],
                      params["ae_gamma"], params["ae_beta"])
    cat = jnp.concatenate([emb, ae], axis=1)
    h = _ref_bn_relu(cat @ params["ap1_w"] + params["ap1_b"],
                     params["ap_gamma"], params["ap_beta"])
    add = h @ params["ap2_w"] + params["ap2_b"]
    return emb, base, add


def _quantize_weights_like_kernel(params):
    """Round the weight matrices to bf16 (as stored for the kernel) so the
    reference comparison isolates kernel-vs-XLA numerics."""
    q = dict(params)
    for k in ("enc_w", "base_w", "ae_w", "ap1_w", "ap2_w"):
        q[k] = params[k].astype(jnp.bfloat16).astype(jnp.float32)
    return q


# ---------------------------------------------------------------------------
if __name__ == "__main__":
    B, C, H, W = 8, 4, 8, 8                 # small NCHW input; C*H*W = 256
    ADD_IN = 16
    NUM_CAT = 2

    key = jax.random.PRNGKey(0)
    kx, kadd, kparams = jax.random.split(key, 3)
    x = jax.random.normal(kx, (B, C, H, W), jnp.float32)
    x_add = jax.random.normal(kadd, (B, ADD_IN), jnp.float32)

    params = init_tram_params(
        kparams,
        in_features=C * H * W,
        add_input_dim=ADD_IN,
        num_categories=NUM_CAT,
        base_predictor_input_dim=256,
        add_encoder_embed_dim=64,
        add_predictor_hidden_dim=128,
    )
    prep = prepare_tram_params(params)       # one-time: pad/split/reshape/bf16

    fwd_train = jax.jit(functools.partial(tram_forward, train=True,
                                          num_categories=NUM_CAT))
    base_pred, add_pred = fwd_train(prep, x, x_add)
    jax.block_until_ready((base_pred, add_pred))

    # eval / get_embedding path
    fwd_eval_emb = jax.jit(functools.partial(tram_forward, train=False,
                                             get_embedding=True,
                                             num_categories=NUM_CAT))
    emb, base_eval = fwd_eval_emb(prep, x)
    jax.block_until_ready((emb, base_eval))

    fwd_eval = jax.jit(functools.partial(tram_forward, train=False,
                                         get_embedding=False,
                                         num_categories=NUM_CAT))
    base_only = fwd_eval(prep, x)
    jax.block_until_ready(base_only)

    # correctness: (a) vs reference using the same bf16-rounded weights
    # (isolates kernel numerics), (b) vs raw-f32 reference (semantic fidelity
    # incl. the bf16 weight quantization error).
    q = _quantize_weights_like_kernel(params)
    emb_q, base_q, add_q = tram_forward_ref(q, x, x_add)
    _, base_raw, add_raw = tram_forward_ref(params, x, x_add)

    assert base_pred.shape == (B, NUM_CAT) and add_pred.shape == (B, NUM_CAT)
    assert emb.shape == (B, 256) and base_eval.shape == (B, NUM_CAT)
    assert base_only.shape == (B, NUM_CAT)

    assert jnp.allclose(base_pred, base_q, rtol=2e-2, atol=2e-2)
    assert jnp.allclose(add_pred, add_q, rtol=2e-2, atol=2e-2)
    assert jnp.allclose(emb, emb_q, rtol=2e-2, atol=2e-2)
    assert jnp.allclose(base_eval, base_q, rtol=2e-2, atol=2e-2)
    assert jnp.allclose(base_only, base_q, rtol=2e-2, atol=2e-2)

    assert jnp.allclose(base_pred, base_raw, rtol=6e-2, atol=6e-2)
    assert jnp.allclose(add_pred, add_raw, rtol=6e-2, atol=6e-2)

    # TODO(synk): BatchNorm running-stat updates (training-state side effect)
    # are not modeled; only the forward batch-stat math is implemented.
    # TODO(synk): .detach() gradient semantics (no grad from base head into the
    # encoder) would require a custom_vjp if this kernel is ever differentiated.

    print("KERNEL_OK")
</pallas_src>

<mosaic_0001>
module attributes {stable_mosaic.version = 11 : i64} {
  func.func @_tram_train_kernel(%arg0: memref<8x256xf32, #tpu.memory_space<vmem>>, %arg1: memref<8x16xf32, #tpu.memory_space<vmem>>, %arg2: memref<256x256xbf16, #tpu.memory_space<vmem>>, %arg3: memref<1x256xf32, #tpu.memory_space<vmem>>, %arg4: memref<256x128xbf16, #tpu.memory_space<vmem>>, %arg5: memref<1x128xf32, #tpu.memory_space<vmem>>, %arg6: memref<16x128xbf16, #tpu.memory_space<vmem>>, %arg7: memref<1x128xf32, #tpu.memory_space<vmem>>, %arg8: memref<1x128xf32, #tpu.memory_space<vmem>>, %arg9: memref<256x128xbf16, #tpu.memory_space<vmem>>, %arg10: memref<128x128xbf16, #tpu.memory_space<vmem>>, %arg11: memref<1x128xf32, #tpu.memory_space<vmem>>, %arg12: memref<1x128xf32, #tpu.memory_space<vmem>>, %arg13: memref<128x128xbf16, #tpu.memory_space<vmem>>, %arg14: memref<1x128xf32, #tpu.memory_space<vmem>>, %arg15: memref<8x256xf32, #tpu.memory_space<vmem>>) attributes {dimension_semantics = [], scalar_prefetch = 0 : i64, scratch_operands = 0 : i64, tpu.core_type = #tpu.core_type<tc>} {
    %c0 = arith.constant 0 : index
    %c0_0 = arith.constant 0 : index
    %0 = vector.load %arg0[%c0, %c0_0] : memref<8x256xf32, #tpu.memory_space<vmem>>, vector<8x256xf32>
    %c0_1 = arith.constant 0 : index
    %c0_2 = arith.constant 0 : index
    %1 = vector.load %arg2[%c0_1, %c0_2] : memref<256x256xbf16, #tpu.memory_space<vmem>>, vector<256x256xbf16>
    %2 = arith.extf %1 : vector<256x256xbf16> to vector<256x256xf32>
    %cst = arith.constant dense<0.000000e+00> : vector<8x256xf32>
    %3 = tpu.matmul %0, %2, %cst {dimension_numbers = #tpu.dot_dimension_numbers<[1], [0], [0], [1], [0, 0, 1, 1], [], []>} : vector<8x256xf32>, vector<256x256xf32>, vector<8x256xf32> -> vector<8x256xf32>
    %c0_3 = arith.constant 0 : index
    %c0_4 = arith.constant 0 : index
    %4 = vector.load %arg3[%c0_3, %c0_4] : memref<1x256xf32, #tpu.memory_space<vmem>>, vector<1x256xf32>
    %5 = vector.broadcast %4 : vector<1x256xf32> to vector<8x256xf32>
    %6 = arith.addf %3, %5 : vector<8x256xf32>
    %cst_5 = arith.constant 0.000000e+00 : f32
    %7 = vector.broadcast %cst_5 : f32 to vector<8x256xf32>
    %8 = arith.maximumf %6, %7 : vector<8x256xf32>
    %c0_6 = arith.constant 0 : index
    %c0_7 = arith.constant 0 : index
    %9 = vector.load %arg4[%c0_6, %c0_7] : memref<256x128xbf16, #tpu.memory_space<vmem>>, vector<256x128xbf16>
    %10 = arith.extf %9 : vector<256x128xbf16> to vector<256x128xf32>
    %cst_8 = arith.constant dense<0.000000e+00> : vector<8x128xf32>
    %11 = tpu.matmul %8, %10, %cst_8 {dimension_numbers = #tpu.dot_dimension_numbers<[1], [0], [0], [1], [0, 0, 1, 1], [], []>} : vector<8x256xf32>, vector<256x128xf32>, vector<8x128xf32> -> vector<8x128xf32>
    %c0_9 = arith.constant 0 : index
    %c0_10 = arith.constant 0 : index
    %12 = vector.load %arg5[%c0_9, %c0_10] : memref<1x128xf32, #tpu.memory_space<vmem>>, vector<1x128xf32>
    %13 = vector.broadcast %12 : vector<1x128xf32> to vector<8x128xf32>
    %14 = arith.addf %11, %13 : vector<8x128xf32>
    %c0_11 = arith.constant 0 : index
    %c0_12 = arith.constant 0 : index
    %15 = vector.load %arg1[%c0_11, %c0_12] : memref<8x16xf32, #tpu.memory_space<vmem>>, vector<8x16xf32>
    %c0_13 = arith.constant 0 : index
    %c0_14 = arith.constant 0 : index
    %16 = vector.load %arg6[%c0_13, %c0_14] : memref<16x128xbf16, #tpu.memory_space<vmem>>, vector<16x128xbf16>
    %17 = arith.extf %16 : vector<16x128xbf16> to vector<16x128xf32>
    %cst_15 = arith.constant dense<0.000000e+00> : vector<8x128xf32>
    %18 = tpu.matmul %15, %17, %cst_15 {dimension_numbers = #tpu.dot_dimension_numbers<[1], [0], [0], [1], [0, 0, 1, 1], [], []>} : vector<8x16xf32>, vector<16x128xf32>, vector<8x128xf32> -> vector<8x128xf32>
    %c0_16 = arith.constant 0 : index
    %c0_17 = arith.constant 0 : index
    %19 = vector.load %arg7[%c0_16, %c0_17] : memref<1x128xf32, #tpu.memory_space<vmem>>, vector<1x128xf32>
    %c0_18 = arith.constant 0 : index
    %c0_19 = arith.constant 0 : index
    %20 = vector.load %arg8[%c0_18, %c0_19] : memref<1x128xf32, #tpu.memory_space<vmem>>, vector<1x128xf32>
    %cst_20 = arith.constant dense<0.000000e+00> : vector<128xf32>
    %21 = vector.multi_reduction <add>, %18, %cst_20 [0] : vector<8x128xf32> to vector<128xf32>
    %22 = vector.shape_cast %21 : vector<128xf32> to vector<1x128xf32>
    %cst_21 = arith.constant 8.000000e+00 : f32
    %23 = vector.broadcast %cst_21 : f32 to vector<1x128xf32>
    %24 = arith.divf %22, %23 : vector<1x128xf32>
    %25 = vector.broadcast %24 : vector<1x128xf32> to vector<8x128xf32>
    %26 = arith.subf %18, %25 : vector<8x128xf32>
    %27 = arith.mulf %26, %26 : vector<8x128xf32>
    %cst_22 = arith.constant dense<0.000000e+00> : vector<128xf32>
    %28 = vector.multi_reduction <add>, %27, %cst_22 [0] : vector<8x128xf32> to vector<128xf32>
    %29 = vector.shape_cast %28 : vector<128xf32> to vector<1x128xf32>
    %cst_23 = arith.constant 8.000000e+00 : f32
    %30 = vector.broadcast %cst_23 : f32 to vector<1x128xf32>
    %31 = arith.divf %29, %30 : vector<1x128xf32>
    %cst_24 = arith.constant 9.99999974E-6 : f32
    %32 = vector.broadcast %cst_24 : f32 to vector<1x128xf32>
    %33 = arith.addf %31, %32 : vector<1x128xf32>
    %34 = math.rsqrt %33 : vector<1x128xf32>
    %35 = arith.mulf %34, %19 : vector<1x128xf32>
    %36 = vector.broadcast %35 : vector<1x128xf32> to vector<8x128xf32>
    %37 = arith.mulf %26, %36 : vector<8x128xf32>
    %38 = vector.broadcast %20 : vector<1x128xf32> to vector<8x128xf32>
    %39 = arith.addf %37, %38 : vector<8x128xf32>
    %cst_25 = arith.constant 0.000000e+00 : f32
    %40 = vector.broadcast %cst_25 : f32 to vector<8x128xf32>
    %41 = arith.maximumf %39, %40 : vector<8x128xf32>
    %c0_26 = arith.constant 0 : index
    %c0_27 = arith.constant 0 : index
    %42 = vector.load %arg9[%c0_26, %c0_27] : memref<256x128xbf16, #tpu.memory_space<vmem>>, vector<256x128xbf16>
    %43 = arith.extf %42 : vector<256x128xbf16> to vector<256x128xf32>
    %cst_28 = arith.constant dense<0.000000e+00> : vector<8x128xf32>
    %44 = tpu.matmul %8, %43, %cst_28 {dimension_numbers = #tpu.dot_dimension_numbers<[1], [0], [0], [1], [0, 0, 1, 1], [], []>} : vector<8x256xf32>, vector<256x128xf32>, vector<8x128xf32> -> vector<8x128xf32>
    %c0_29 = arith.constant 0 : index
    %c0_30 = arith.constant 0 : index
    %45 = vector.load %arg10[%c0_29, %c0_30] : memref<128x128xbf16, #tpu.memory_space<vmem>>, vector<128x128xbf16>
    %46 = arith.extf %45 : vector<128x128xbf16> to vector<128x128xf32>
    %cst_31 = arith.constant dense<0.000000e+00> : vector<8x128xf32>
    %47 = tpu.matmul %41, %46, %cst_31 {dimension_numbers = #tpu.dot_dimension_numbers<[1], [0], [0], [1], [0, 0, 1, 1], [], []>} : vector<8x128xf32>, vector<128x128xf32>, vector<8x128xf32> -> vector<8x128xf32>
    %48 = arith.addf %44, %47 : vector<8x128xf32>
    %c0_32 = arith.constant 0 : index
    %c0_33 = arith.constant 0 : index
    %49 = vector.load %arg11[%c0_32, %c0_33] : memref<1x128xf32, #tpu.memory_space<vmem>>, vector<1x128xf32>
    %c0_34 = arith.constant 0 : index
    %c0_35 = arith.constant 0 : index
    %50 = vector.load %arg12[%c0_34, %c0_35] : memref<1x128xf32, #tpu.memory_space<vmem>>, vector<1x128xf32>
    %cst_36 = arith.constant dense<0.000000e+00> : vector<128xf32>
    %51 = vector.multi_reduction <add>, %48, %cst_36 [0] : vector<8x128xf32> to vector<128xf32>
    %52 = vector.shape_cast %51 : vector<128xf32> to vector<1x128xf32>
    %cst_37 = arith.constant 8.000000e+00 : f32
    %53 = vector.broadcast %cst_37 : f32 to vector<1x128xf32>
    %54 = arith.divf %52, %53 : vector<1x128xf32>
    %55 = vector.broadcast %54 : vector<1x128xf32> to vector<8x128xf32>
    %56 = arith.subf %48, %55 : vector<8x128xf32>
    %57 = arith.mulf %56, %56 : vector<8x128xf32>
    %cst_38 = arith.constant dense<0.000000e+00> : vector<128xf32>
    %58 = vector.multi_reduction <add>, %57, %cst_38 [0] : vector<8x128xf32> to vector<128xf32>
    %59 = vector.shape_cast %58 : vector<128xf32> to vector<1x128xf32>
    %cst_39 = arith.constant 8.000000e+00 : f32
    %60 = vector.broadcast %cst_39 : f32 to vector<1x128xf32>
    %61 = arith.divf %59, %60 : vector<1x128xf32>
    %cst_40 = arith.constant 9.99999974E-6 : f32
    %62 = vector.broadcast %cst_40 : f32 to vector<1x128xf32>
    %63 = arith.addf %61, %62 : vector<1x128xf32>
    %64 = math.rsqrt %63 : vector<1x128xf32>
    %65 = arith.mulf %64, %49 : vector<1x128xf32>
    %66 = vector.broadcast %65 : vector<1x128xf32> to vector<8x128xf32>
    %67 = arith.mulf %56, %66 : vector<8x128xf32>
    %68 = vector.broadcast %50 : vector<1x128xf32> to vector<8x128xf32>
    %69 = arith.addf %67, %68 : vector<8x128xf32>
    %cst_41 = arith.constant 0.000000e+00 : f32
    %70 = vector.broadcast %cst_41 : f32 to vector<8x128xf32>
    %71 = arith.maximumf %69, %70 : vector<8x128xf32>
    %c0_42 = arith.constant 0 : index
    %c0_43 = arith.constant 0 : index
    %72 = vector.load %arg13[%c0_42, %c0_43] : memref<128x128xbf16, #tpu.memory_space<vmem>>, vector<128x128xbf16>
    %73 = arith.extf %72 : vector<128x128xbf16> to vector<128x128xf32>
    %cst_44 = arith.constant dense<0.000000e+00> : vector<8x128xf32>
    %74 = tpu.matmul %71, %73, %cst_44 {dimension_numbers = #tpu.dot_dimension_numbers<[1], [0], [0], [1], [0, 0, 1, 1], [], []>} : vector<8x128xf32>, vector<128x128xf32>, vector<8x128xf32> -> vector<8x128xf32>
    %c0_45 = arith.constant 0 : index
    %c0_46 = arith.constant 0 : index
    %75 = vector.load %arg14[%c0_45, %c0_46] : memref<1x128xf32, #tpu.memory_space<vmem>>, vector<1x128xf32>
    %76 = vector.broadcast %75 : vector<1x128xf32> to vector<8x128xf32>
    %77 = arith.addf %74, %76 : vector<8x128xf32>
    %c0_47 = arith.constant 0 : index
    %c0_48 = arith.constant 0 : index
    %78 = vector.load %arg15[%c0_47, %c0_48] : memref<8x256xf32, #tpu.memory_space<vmem>>, vector<8x128xf32>
    tpu.vector_store %arg15[%c0_47, %c0_48], %14 {strides = array<i32>} : memref<8x256xf32, #tpu.memory_space<vmem>>, vector<8x128xf32>,
    %c0_49 = arith.constant 0 : index
    %c128 = arith.constant 128 : index
    %79 = vector.load %arg15[%c0_49, %c128] : memref<8x256xf32, #tpu.memory_space<vmem>>, vector<8x128xf32>
    tpu.vector_store %arg15[%c0_49, %c128], %77 {strides = array<i32>} : memref<8x256xf32, #tpu.memory_space<vmem>>, vector<8x128xf32>,
    return
  }
}

</mosaic_0001>

<bundles_post_ra>
// kernel: tram_forward.1
= control target key start
LH: loop header
LB: loop body
LE: loop exit
PB: predicated region body
PF: predicated region fallthrough
CT: control target
= control target key end

     0   :  { %20 = vsyncpa [#allocation3], 0  ;;  %s1350_s0 = inlined_call_operand.vmem [shape: f32[8,256], index: 0, kind: input, shape index: {}]   ;;  %s1351_s1 = inlined_call_operand.vmem [shape: f32[8,16], index: 1, kind: input, shape index: {}]   ;;  %s1352_s2 = inlined_call_operand.vmem [shape: bf16[256,256], index: 2, kind: input, shape index: {}]   ;;  %s1353_s3 = inlined_call_operand.vmem [shape: f32[1,256], index: 3, kind: input, shape index: {}]   ;;  %s1354_s4 = inlined_call_operand.hbm [shape: bf16[256,128], index: 4, kind: input, shape index: {}]   ;;  %s1355_s5 = inlined_call_operand.vmem [shape: f32[1,128], index: 5, kind: input, shape index: {}]   ;;  %s1356_s6 = inlined_call_operand.vmem [shape: bf16[16,128], index: 6, kind: input, shape index: {}]   ;;  %s1357_s7 = inlined_call_operand.vmem [shape: f32[1,128], index: 7, kind: input, shape index: {}]   ;;  %s1358_s8 = inlined_call_operand.vmem [shape: f32[1,128], index: 8, kind: input, shape index: {}]   ;;  %s1359_s9 = inlined_call_operand.hbm [shape: bf16[256,128], index: 9, kind: input, shape index: {}]   ;;  %s1360_s10 = inlined_call_operand.hbm [shape: bf16[128,128], index: 10, kind: input, shape index: {}]   ;;  %s1361_s11 = inlined_call_operand.vmem [shape: f32[1,128], index: 11, kind: input, shape index: {}]   ;;  %s1362_s12 = inlined_call_operand.vmem [shape: f32[1,128], index: 12, kind: input, shape index: {}]   ;;  %s1363_s13 = inlined_call_operand.hbm [shape: bf16[128,128], index: 13, kind: input, shape index: {}]   ;;  %s1364_s14 = inlined_call_operand.vmem [shape: f32[1,128], index: 14, kind: input, shape index: {}]   ;;  %s1365_s15 = inlined_call_operand.vmem [shape: f32[8,256], index: 15, kind: output, shape index: {}]  }
   0x1   :  { %21 = vsyncpa [#allocation5], 0 }
   0x2   :  { %22 = vsyncpa [#allocation8], 0  ;;  %s56_s20 = sshll.u32 %s1359_s9, 4  ;;  %s1098_s21 = smov [#allocation4]   ;;  %s57_s20 = int_to_ptr.hbm [resolvable:$true] %s56_s20 }
   0x3   :  { %s58_s22 = sshll.u32 %s1098_s21, 4  ;;  %s35_s25 = sshll.u32 %s1354_s4, 4  ;;  %s59_s22 = int_to_ptr.vmem [resolvable:$true] %s58_s22  ;;  %s36_s25 = int_to_ptr.hbm [resolvable:$true] %s35_s25 }
   0x4   :  { %s1099_s26 = smov 64   ;;  %s1100_s27 = smov 4  }
   0x5   :  { %64 = dma.hbm_to_vmem [thread:$0]  %s57_s20, 2048, %s59_s22, [#allocation5], %s1099_s26, %s1099_s26, %s1100_s27  }
   0x6   :  { %s1101_s28 = smov [#allocation2]   ;;  %s69_s17 = sshll.u32 %s1360_s10, 4  ;;  %s70_s17 = int_to_ptr.hbm [resolvable:$true] %s69_s17 }
   0x7   :  { %s37_s29 = sshll.u32 %s1101_s28, 4  ;;  %s86_s19 = sshll.u32 %s1363_s13, 4  ;;  %s38_s29 = int_to_ptr.vmem [resolvable:$true] %s37_s29  ;;  %s87_s19 = int_to_ptr.hbm [resolvable:$true] %s86_s19 }
   0x8   :  { %43 = dma.hbm_to_vmem [thread:$0]  %s36_s25, 2048, %s38_s29, [#allocation3], %s1099_s26, %s1099_s26, %s1100_s27  }
   0x9   :  { %s1102_s21 = smov [#allocation6]   ;;  %s1103_s4 = smov [#allocation7]  }
   0xa   :  { %s71_s23 = sshll.u32 %s1102_s21, 4  ;;  %s88_s20 = sshll.u32 %s1103_s4, 4  ;;  %s72_s23 = int_to_ptr.vmem [resolvable:$true] %s71_s23  ;;  %s89_s20 = int_to_ptr.vmem [resolvable:$true] %s88_s20 }
   0xb   :  { %77 = dma.hbm_to_vmem [thread:$0]  %s70_s17, 1024, %s72_s23, [#allocation5], %s1099_s26, %s1099_s26, %s1100_s27  }
   0xc   :  { %94 = dma.hbm_to_vmem [thread:$0]  %s87_s19, 1024, %s89_s20, [#allocation8], %s1099_s26, %s1099_s26, %s1100_s27  }
   0xd   :  { %1092 = dma.done.wait [#allocation3], 2048  }
   0xe   :  { %1093 = vsyncadd [#allocation3], 4294965248 }
   0xf   :  { %1094 = dma.done.wait [#allocation5], 3072  }
  0x10   :  { %1095 = vsyncadd [#allocation5], 4294964224 }
  0x11   :  { %1096 = dma.done.wait [#allocation8], 1024  }
  0x12   :  { %1097 = vsyncadd [#allocation8], 4294966272  ;;  %v130_v0 = vld [vmem:[%s1352_s2 + $0x78] sm:$0xff]  ;;  %v129_v1 = vld [vmem:[%s1352_s2 + $0x70] sm:$0xff]  ;;  %vm412_vm0 = vcmask 130048  }
  0x13   :  { %v146_v2 = vld [vmem:[%s1352_s2 + $0xf8] sm:$0xff]  ;;  %v177_v3 = vunpack.c.l.bf16 %v130_v0  ;;  %v178_v4 = vunpack.c.h.bf16 %v130_v0  ;;  %v175_v5 = vunpack.c.l.bf16 %v129_v1  ;;  %v128_v7 = vld [vmem:[%s1352_s2 + $0x68] sm:$0xff]  ;;  %v145_v8 = vld [vmem:[%s1352_s2 + $0xf0] sm:$0xff]  ;;  %v176_v9 = vunpack.c.h.bf16 %v129_v1 }
  0x14   :  { %v209_v6 = vunpack.c.l.bf16 %v146_v2  ;;  %v210_v10 = vunpack.c.h.bf16 %v146_v2  ;;  %v207_v11 = vunpack.c.l.bf16 %v145_v8  ;;  %v127_v12 = vld [vmem:[%s1352_s2 + $0x60] sm:$0xff]  ;;  %v144_v13 = vld [vmem:[%s1352_s2 + $0xe8] sm:$0xff]  ;;  %v173_v14 = vunpack.c.l.bf16 %v128_v7  ;;  %v126_v20 = vld [vmem:[%s1352_s2 + $0x58] sm:$0xff] }
  0x15   :  { %217 = vmatpush.msra.mxu0 %v177_v3  ;;  %257 = vmatpush.msra.mxu2 %v178_v4  ;;  %v174_v15 = vunpack.c.h.bf16 %v128_v7  ;;  %v208_v16 = vunpack.c.h.bf16 %v145_v8  ;;  %v143_v17 = vld [vmem:[%s1352_s2 + $0xe0] sm:$0xff]  ;;  %v205_v18 = vunpack.c.l.bf16 %v144_v13  ;;  %v206_v19 = vunpack.c.h.bf16 %v144_v13  ;;  %v142_v23 = vld [vmem:[%s1352_s2 + $0xd8] sm:$0xff]  ;;  %v125_v26 = vld [vmem:[%s1352_s2 + $0x50] sm:$0xff] }
  0x16   :  { %237 = vmatpush.msra.mxu1 %v209_v6  ;;  %277 = vmatpush.msra.mxu3 %v210_v10  ;;  %v171_v21 = vunpack.c.l.bf16 %v127_v12  ;;  %v172_v22 = vunpack.c.h.bf16 %v127_v12  ;;  %v203_v24 = vunpack.c.l.bf16 %v143_v17  ;;  %v204_v25 = vunpack.c.h.bf16 %v143_v17  ;;  %v141_v29 = vld [vmem:[%s1352_s2 + $0xd0] sm:$0xff]  ;;  %v124_v32 = vld [vmem:[%s1352_s2 + $0x48] sm:$0xff]  ;;  %v123_v38 = vld [vmem:[%s1352_s2 + $0x40] sm:$0xff] }
  0x17   :  { %218 = vmatpush.msra.mxu0 %v175_v5  ;;  %258 = vmatpush.msra.mxu2 %v176_v9  ;;  %v169_v27 = vunpack.c.l.bf16 %v126_v20  ;;  %v170_v28 = vunpack.c.h.bf16 %v126_v20  ;;  %v201_v30 = vunpack.c.l.bf16 %v142_v23  ;;  %v202_v31 = vunpack.c.h.bf16 %v142_v23  ;;  %v140_v35 = vld [vmem:[%s1352_s2 + $0xc8] sm:$0xff]  ;;  %v139_v41 = vld [vmem:[%s1352_s2 + $0xc0] sm:$0xff]  ;;  %v122_v44 = vld [vmem:[%s1352_s2 + $0x38] sm:$0xff] }
  0x18   :  { %238 = vmatpush.msra.mxu1 %v207_v11  ;;  %278 = vmatpush.msra.mxu3 %v208_v16  ;;  %v167_v33 = vunpack.c.l.bf16 %v125_v26  ;;  %v168_v34 = vunpack.c.h.bf16 %v125_v26  ;;  %v199_v36 = vunpack.c.l.bf16 %v141_v29  ;;  %v200_v37 = vunpack.c.h.bf16 %v141_v29  ;;  %v138_v45 = vld [vmem:[%s1352_s2 + $0xb8] sm:$0xff]  ;;  %v121_v50 = vld [vmem:[%s1352_s2 + $0x30] sm:$0xff]  ;;  %v120_v56 = vld [vmem:[%s1352_s2 + $0x28] sm:$0xff] }
  0x19   :  { %219 = vmatpush.msra.mxu0 %v173_v14  ;;  %259 = vmatpush.msra.mxu2 %v174_v15  ;;  %v165_v39 = vunpack.c.l.bf16 %v124_v32  ;;  %v166_v40 = vunpack.c.h.bf16 %v124_v32  ;;  %v197_v42 = vunpack.c.l.bf16 %v140_v35  ;;  %v198_v43 = vunpack.c.h.bf16 %v140_v35  ;;  %v137_v53 = vld [vmem:[%s1352_s2 + $0xb0] sm:$0xff]  ;;  %v136_v59 = vld [vmem:[%s1352_s2 + $0xa8] sm:$0xff]  ;;  %v119_v62 = vld [vmem:[%s1352_s2 + $0x20] sm:$0xff] }
  0x1a   :  { %239 = vmatpush.msra.mxu1 %v205_v18  ;;  %279 = vmatpush.msra.mxu3 %v206_v19  ;;  %v163_v46 = vunpack.c.l.bf16 %v123_v38  ;;  %v164_v47 = vunpack.c.h.bf16 %v123_v38  ;;  %v195_v48 = vunpack.c.l.bf16 %v139_v41  ;;  %v196_v49 = vunpack.c.h.bf16 %v139_v41  ;;  %v135_v1 = vld [vmem:[%s1352_s2 + $0xa0] sm:$0xff]  ;;  %v118_v4 = vld [vmem:[%s1352_s2 + $0x18] sm:$0xff]  ;;  %v117_v10 = vld [vmem:[%s1352_s2 + $0x10] sm:$0xff] }
  0x1b   :  { %220 = vmatpush.msra.mxu0 %v171_v21  ;;  %260 = vmatpush.msra.mxu2 %v172_v22  ;;  %v161_v51 = vunpack.c.l.bf16 %v122_v44  ;;  %v162_v52 = vunpack.c.h.bf16 %v122_v44  ;;  %v193_v54 = vunpack.c.l.bf16 %v138_v45  ;;  %v194_v55 = vunpack.c.h.bf16 %v138_v45  ;;  %v134_v7 = vld [vmem:[%s1352_s2 + $0x98] sm:$0xff]  ;;  %v133_v13 = vld [vmem:[%s1352_s2 + $0x90] sm:$0xff]  ;;  %v116_v16 = vld [vmem:[%s1352_s2 + $0x8] sm:$0xff] }
  0x1c   :  { %240 = vmatpush.msra.mxu1 %v203_v24  ;;  %280 = vmatpush.msra.mxu3 %v204_v25  ;;  %v159_v57 = vunpack.c.l.bf16 %v121_v50  ;;  %v160_v58 = vunpack.c.h.bf16 %v121_v50  ;;  %v191_v60 = vunpack.c.l.bf16 %v137_v53  ;;  %v192_v61 = vunpack.c.h.bf16 %v137_v53  ;;  %v132_v19 = vld [vmem:[%s1352_s2 + $0x88] sm:$0xff]  ;;  %v115_v22 = vld [vmem:[%s1352_s2] sm:$0xff]  ;;  %v948_v44 = vld [vmem:[#allocation2 + $0x70] sm:$0xff]  }
  0x1d   :  { %221 = vmatpush.msra.mxu0 %v169_v27  ;;  %261 = vmatpush.msra.mxu2 %v170_v28  ;;  %v157_v63 = vunpack.c.l.bf16 %v120_v56  ;;  %v158_v0 = vunpack.c.h.bf16 %v120_v56  ;;  %v189_v2 = vunpack.c.l.bf16 %v136_v59  ;;  %v190_v3 = vunpack.c.h.bf16 %v136_v59  ;;  %v804_v27 = vld [vmem:[%s1356_s6] sm:$0xff]   ;;  %v937_v59 = vld [vmem:[#allocation2 + $0x18] sm:$0xff]  }
  0x1e   :  { %241 = vmatpush.msra.mxu1 %v201_v30  ;;  %281 = vmatpush.msra.mxu3 %v202_v31  ;;  %v155_v5 = vunpack.c.l.bf16 %v119_v62  ;;  %v156_v6 = vunpack.c.h.bf16 %v119_v62  ;;  %v187_v8 = vunpack.c.l.bf16 %v135_v1  ;;  %v188_v9 = vunpack.c.h.bf16 %v135_v1  ;;  %v131_v28 = vld [vmem:[%s1352_s2 + $0x80] sm:$0xff]  ;;  %v936_v1 = vld [vmem:[#allocation2 + $0x10] sm:$0xff]  }
  0x1f   :  { %222 = vmatpush.msra.mxu0 %v167_v33  ;;  %262 = vmatpush.msra.mxu2 %v168_v34  ;;  %v153_v11 = vunpack.c.l.bf16 %v118_v4  ;;  %v154_v12 = vunpack.c.h.bf16 %v118_v4  ;;  %v185_v14 = vunpack.c.l.bf16 %v134_v7  ;;  %v186_v15 = vunpack.c.h.bf16 %v134_v7  ;;  %v113_v31 = vld [vmem:[%s1350_s0] sm:$0xff]  ;;  %v941_v34 = vld [vmem:[#allocation2 + $0x38] sm:$0xff]  }
  0x20   :  { %242 = vmatpush.msra.mxu1 %v199_v36  ;;  %282 = vmatpush.msra.mxu3 %v200_v37  ;;  %v151_v17 = vunpack.c.l.bf16 %v117_v10  ;;  %v152_v18 = vunpack.c.h.bf16 %v117_v10  ;;  %v183_v20 = vunpack.c.l.bf16 %v133_v13  ;;  %v184_v21 = vunpack.c.h.bf16 %v133_v13  ;;  %v114_v36 = vld [vmem:[%s1350_s0 + $0x8] sm:$0xff]  ;;  %v938_v53 = vld [vmem:[#allocation2 + $0x20] sm:$0xff]  }
  0x21   :  { %223 = vmatpush.msra.mxu0 %v165_v39  ;;  %263 = vmatpush.msra.mxu2 %v166_v40  ;;  %v149_v23 = vunpack.c.l.bf16 %v116_v16  ;;  %v150_v24 = vunpack.c.h.bf16 %v116_v16  ;;  %v181_v25 = vunpack.c.l.bf16 %v132_v19  ;;  %v182_v26 = vunpack.c.h.bf16 %v132_v19  ;;  %v949_v39 = vld [vmem:[#allocation2 + $0x78] sm:$0xff]   ;;  %v940_v40 = vld [vmem:[#allocation2 + $0x30] sm:$0xff]  }
  0x22   :  { %243 = vmatpush.msra.mxu1 %v197_v42  ;;  %283 = vmatpush.msra.mxu3 %v198_v43  ;;  %v147_v29 = vunpack.c.l.bf16 %v115_v22  ;;  %v148_v30 = vunpack.c.h.bf16 %v115_v22  ;;  %v806_v32 = vunpack.c.h.bf16 %v804_v27  ;;  %v179_v33 = vunpack.c.l.bf16 %v131_v28 }
  0x23   :  { %224 = vmatpush.msra.mxu0 %v163_v46  ;;  %264 = vmatpush.msra.mxu2 %v164_v47  ;;  %v180_v35 = vunpack.c.h.bf16 %v131_v28  ;;  %v805_v37 = vunpack.c.l.bf16 %v804_v27  ;;  %v770_v38 = vunpack.c.h.bf16 %v941_v34  ;;  %v802_v41 = vunpack.c.h.bf16 %v949_v39  ;;  %v407_v46 = vld [vmem:[%s1351_s1] sm:$0xff]  ;;  %v939_v47 = vld [vmem:[#allocation2 + $0x28] sm:$0xff]   ;;  %v944_v27 = vld [vmem:[#allocation2 + $0x50] sm:$0xff]  }
  0x24   :  { %244 = vmatpush.msra.mxu1 %v195_v48  ;;  %284 = vmatpush.msra.mxu3 %v196_v49  ;;  %v769_v42 = vunpack.c.l.bf16 %v941_v34  ;;  %v801_v43 = vunpack.c.l.bf16 %v949_v39  ;;  %v766_v45 = vunpack.c.h.bf16 %v940_v40  ;;  %v798_v48 = vunpack.c.h.bf16 %v948_v44  ;;  %v942_v39 = vld [vmem:[#allocation2 + $0x40] sm:$0xff]  }
  0x25   :  { %225 = vmatpush.msra.mxu0 %v161_v51  ;;  %265 = vmatpush.msra.mxu2 %v162_v52  ;;  %v765_v49 = vunpack.c.l.bf16 %v940_v40  ;;  %v797_v50 = vunpack.c.l.bf16 %v948_v44  ;;  %v947_v51 = vld [vmem:[#allocation2 + $0x68] sm:$0xff]   ;;  %v762_v52 = vunpack.c.h.bf16 %v939_v47  ;;  %v750_v4 = vunpack.c.h.bf16 %v936_v1 }
  0x26   :  { %245 = vmatpush.msra.mxu1 %v193_v54  ;;  %285 = vmatpush.msra.mxu3 %v194_v55  ;;  %v794_v54 = vunpack.c.h.bf16 %v947_v51  ;;  %v761_v55 = vunpack.c.l.bf16 %v939_v47  ;;  %v793_v56 = vunpack.c.l.bf16 %v947_v51  ;;  %v782_v28 = vunpack.c.h.bf16 %v944_v27 }
  0x27   :  { %226 = vmatpush.msra.mxu0 %v159_v57  ;;  %266 = vmatpush.msra.mxu2 %v160_v58  ;;  %v946_v57 = vld [vmem:[#allocation2 + $0x60] sm:$0xff]   ;;  %v758_v58 = vunpack.c.h.bf16 %v938_v53  ;;  %v774_v40 = vunpack.c.h.bf16 %v942_v39 }
  0x28   :  { %246 = vmatpush.msra.mxu1 %v191_v60  ;;  %286 = vmatpush.msra.mxu3 %v192_v61  ;;  %v790_v60 = vunpack.c.h.bf16 %v946_v57  ;;  %v757_v61 = vunpack.c.l.bf16 %v938_v53  ;;  %v789_v62 = vunpack.c.l.bf16 %v946_v57 }
  0x29   :  { %227 = vmatpush.msra.mxu0 %v157_v63  ;;  %267 = vmatpush.msra.mxu2 %v158_v0  ;;  %v945_v63 = vld [vmem:[#allocation2 + $0x58] sm:$0xff]   ;;  %v754_v0 = vunpack.c.h.bf16 %v937_v59 }
  0x2a   :  { %247 = vmatpush.msra.mxu1 %v189_v2  ;;  %287 = vmatpush.msra.mxu3 %v190_v3  ;;  %v786_v2 = vunpack.c.h.bf16 %v945_v63  ;;  %v753_v3 = vunpack.c.l.bf16 %v937_v59 }
  0x2b   :  { %228 = vmatpush.msra.mxu0 %v155_v5  ;;  %268 = vmatpush.msra.mxu2 %v156_v6  ;;  %v935_v5 = vld [vmem:[#allocation2 + $0x8] sm:$0xff]   ;;  %v749_v6 = vunpack.c.l.bf16 %v936_v1 }
  0x2c   :  { %248 = vmatpush.msra.mxu1 %v187_v8  ;;  %288 = vmatpush.msra.mxu3 %v188_v9  ;;  %v746_v7 = vunpack.c.h.bf16 %v935_v5  ;;  %v740_v8 = vld [vmem:[#allocation2] sm:$0xff]   ;;  %v745_v9 = vunpack.c.l.bf16 %v935_v5 }
  0x2d   :  { %229 = vmatpush.msra.mxu0 %v153_v11  ;;  %269 = vmatpush.msra.mxu2 %v154_v12  ;;  %v742_v10 = vunpack.c.h.bf16 %v740_v8  ;;  %v964_v11 = vld [vmem:[#allocation4 + $0x78] sm:$0xff]   ;;  %v741_v12 = vunpack.c.l.bf16 %v740_v8  ;;  %v970_v8 = vld [vmem:[#allocation6 + $0x30] sm:$0xff]  }
  0x2e   :  { %249 = vmatpush.msra.mxu1 %v185_v14  ;;  %289 = vmatpush.msra.mxu3 %v186_v15  ;;  %v870_v13 = vunpack.c.h.bf16 %v964_v11  ;;  %v963_v14 = vld [vmem:[#allocation4 + $0x70] sm:$0xff]   ;;  %v869_v15 = vunpack.c.l.bf16 %v964_v11  ;;  %v898_v11 = vunpack.c.h.bf16 %v970_v8 }
  0x2f   :  { %230 = vmatpush.msra.mxu0 %v151_v17  ;;  %270 = vmatpush.msra.mxu2 %v152_v18  ;;  %v866_v16 = vunpack.c.h.bf16 %v963_v14  ;;  %v962_v17 = vld [vmem:[#allocation4 + $0x68] sm:$0xff]   ;;  %v865_v18 = vunpack.c.l.bf16 %v963_v14  ;;  %v897_v14 = vunpack.c.l.bf16 %v970_v8 }
  0x30   :  { %250 = vmatpush.msra.mxu1 %v183_v20  ;;  %290 = vmatpush.msra.mxu3 %v184_v21  ;;  %v862_v19 = vunpack.c.h.bf16 %v962_v17  ;;  %v961_v20 = vld [vmem:[#allocation4 + $0x60] sm:$0xff]   ;;  %v861_v21 = vunpack.c.l.bf16 %v962_v17  ;;  %v969_v17 = vld [vmem:[#allocation6 + $0x28] sm:$0xff]  }
  0x31   :  { %231 = vmatpush.msra.mxu0 %v149_v23  ;;  %271 = vmatpush.msra.mxu2 %v150_v24  ;;  %v858_v22 = vunpack.c.h.bf16 %v961_v20  ;;  %v857_v23 = vunpack.c.l.bf16 %v961_v20  ;;  %v960_v24 = vld [vmem:[#allocation4 + $0x58] sm:$0xff]   ;;  %v894_v20 = vunpack.c.h.bf16 %v969_v17 }
  0x32   :  { %251 = vmatpush.msra.mxu1 %v181_v25  ;;  %291 = vmatpush.msra.mxu3 %v182_v26  ;;  %v785_v25 = vunpack.c.l.bf16 %v945_v63  ;;  %v854_v26 = vunpack.c.h.bf16 %v960_v24  ;;  %v971_v63 = vld [vmem:[#allocation6 + $0x38] sm:$0xff]  }
  0x33   :  { %232 = vmatpush.msra.mxu0 %v147_v29  ;;  %272 = vmatpush.msra.mxu2 %v148_v30  ;;  %v853_v29 = vunpack.c.l.bf16 %v960_v24  ;;  %v959_v30 = vld [vmem:[#allocation4 + $0x50] sm:$0xff]   ;;  %v902_v1 = vunpack.c.h.bf16 %v971_v63  ;;  %v901_v5 = vunpack.c.l.bf16 %v971_v63 }
  0x34   :  { %233 = vmatmul.f32.vlgmr.msra.gmra.mxu0 %v113_v31  ;;  %273 = vmatmul.f32.vlgmr.msra.gmra.mxu2 %v113_v31  ;;  %v781_v31 = vunpack.c.l.bf16 %v944_v27  ;;  %v953_v27 = vld [vmem:[#allocation4 + $0x20] sm:$0xff]  }
  0x35   :  { %430 = vmatpush.msrb.mxu2 %v806_v32  ;;  %252 = vmatpush.msra.mxu1 %v179_v33  ;;  %v850_v32 = vunpack.c.h.bf16 %v959_v30  ;;  %v943_v33 = vld [vmem:[#allocation2 + $0x48] sm:$0xff]  }
  0x36   :  { %292 = vmatpush.msra.mxu3 %v180_v35  ;;  %253 = vmatmul.f32.vlgmr.msra.gmra.mxu1 %v114_v36  ;;  %v778_v34 = vunpack.c.h.bf16 %v943_v33  ;;  %v849_v35 = vunpack.c.l.bf16 %v959_v30  ;;  %v826_v30 = vunpack.c.h.bf16 %v953_v27 }
  0x37   :  { %293 = vmatmul.f32.vlgmr.msra.gmra.mxu3 %v114_v36  ;;  %431 = vmatpush.msrb.mxu2 %v805_v37  ;;  %v958_v36 = vld [vmem:[#allocation4 + $0x48] sm:$0xff]   ;;  %v777_v37 = vunpack.c.l.bf16 %v943_v33  ;;  %v825_v33 = vunpack.c.l.bf16 %v953_v27 }
  0x38   :  { %367 = vmatpush.msrb.mxu0 %v770_v38  ;;  %387 = vmatpush.msrb.mxu1 %v802_v41  ;;  %v846_v38 = vunpack.c.h.bf16 %v958_v36  ;;  %v845_v41 = vunpack.c.l.bf16 %v958_v36 }
  0x39   :  { %576 = vmatpush.msrb.mxu3 %v902_v1 }
  0x3a   :  { %368 = vmatpush.msrb.mxu0 %v769_v42  ;;  %388 = vmatpush.msrb.mxu1 %v801_v43  ;;  %v957_v42 = vld [vmem:[#allocation4 + $0x40] sm:$0xff]   ;;  %v773_v43 = vunpack.c.l.bf16 %v942_v39 }
  0x3b   :  { %v842_v44 = vunpack.c.h.bf16 %v957_v42  ;;  %577 = vmatpush.msrb.mxu3 %v901_v5 }
  0x3c   :  { %738 = vmatmul.msk.f32.vlgmr.msrb.gmra.mxu2 %vm412_vm0, %v407_v46  ;;  %369 = vmatpush.msrb.mxu0 %v766_v45  ;;  %v841_v45 = vunpack.c.l.bf16 %v957_v42  ;;  %v211_v46 = vld [vmem:[%s1353_s3] sm:$0x3]  ;;  %v966_v42 = vld [vmem:[#allocation6 + $0x10] sm:$0xff]  }
  0x3d   :  { %389 = vmatpush.msrb.mxu1 %v798_v48  ;;  %v213_v47 = vperm.slane %v211_v46, 0  ;;  %v1104_v48 = vmov 8.0   ;;  %v214_v53 = vperm.slane %v211_v46, 1  ;;  %578 = vmatpush.msrb.mxu3 %v898_v11  ;;  %v436_v11 = vld [vmem:[%s1357_s7] sm:$0x1] }
  0x3e   :  { %370 = vmatpush.msrb.mxu0 %v765_v49  ;;  %990 = vrcp.f32 %v1104_v48  ;;  %v881_v48 = vunpack.c.l.bf16 %v966_v42 }
  0x3f   :  { %390 = vmatpush.msrb.mxu1 %v797_v50  ;;  %579 = vmatpush.msrb.mxu3 %v897_v14 }
  0x40   :  { %371 = vmatpush.msrb.mxu0 %v762_v52 }
  0x41   :  { %391 = vmatpush.msrb.mxu1 %v794_v54  ;;  %580 = vmatpush.msrb.mxu3 %v894_v20 }
  0x42   :  { %372 = vmatpush.msrb.mxu0 %v761_v55 }
  0x43   :  { %392 = vmatpush.msrb.mxu1 %v793_v56 }
  0x44   :  { %373 = vmatpush.msrb.mxu0 %v758_v58  ;;  %v991_v54 = vpop.eup %990 }
  0x45   :  { %393 = vmatpush.msrb.mxu1 %v790_v60  ;;  %v445_v58 = vmul.f32 8.0, %v991_v54  ;;  %vm449_vm1 = vweird.f32 %v991_v54 }
  0x46   :  { %374 = vmatpush.msrb.mxu0 %v757_v61 }
  0x47   :  { %394 = vmatpush.msrb.mxu1 %v789_v62  ;;  %v446_v62 = vsub.f32 1.0, %v445_v58 }
  0x48   :  { %375 = vmatpush.msrb.mxu0 %v754_v0  ;;  %v956_v0 = vld [vmem:[#allocation4 + $0x38] sm:$0xff]  }
  0x49   :  { %395 = vmatpush.msrb.mxu1 %v786_v2  ;;  %v838_v2 = vunpack.c.h.bf16 %v956_v0 }
  0x4a   :  { %376 = vmatpush.msrb.mxu0 %v753_v3 }
  0x4b   :  { %396 = vmatpush.msrb.mxu1 %v785_v25  ;;  %596 = vmatpush.msra.mxu2 %v838_v2 }
  0x4c   :  { %377 = vmatpush.msrb.mxu0 %v750_v4 }
  0x4d   :  { %397 = vmatpush.msrb.mxu1 %v782_v28 }
  0x4e   :  { %378 = vmatpush.msrb.mxu0 %v749_v6  ;;  %v837_v6 = vunpack.c.l.bf16 %v956_v0 }
  0x4f   :  { %398 = vmatpush.msrb.mxu1 %v781_v31 }
  0x50   :  { %379 = vmatpush.msrb.mxu0 %v746_v7  ;;  %v447_v7 = vmul.f32 %v991_v54, %v446_v62  ;;  %597 = vmatpush.msra.mxu2 %v837_v6 }
  0x51   :  { %399 = vmatpush.msrb.mxu1 %v778_v34  ;;  %v967_v34 = vld [vmem:[#allocation6 + $0x18] sm:$0xff]  }
  0x52   :  { %380 = vmatpush.msrb.mxu0 %v745_v9  ;;  %v955_v9 = vld [vmem:[#allocation4 + $0x30] sm:$0xff]  }
  0x53   :  { %400 = vmatpush.msrb.mxu1 %v777_v37  ;;  %v886_v37 = vunpack.c.h.bf16 %v967_v34 }
  0x54   :  { %381 = vmatpush.msrb.mxu0 %v742_v10 }
  0x55   :  { %401 = vmatpush.msrb.mxu1 %v774_v40  ;;  %v885_v40 = vunpack.c.l.bf16 %v967_v34 }
  0x56   :  { %382 = vmatpush.msrb.mxu0 %v741_v12  ;;  %v834_v12 = vunpack.c.h.bf16 %v955_v9 }
  0x57   :  { %402 = vmatpush.msrb.mxu1 %v773_v43  ;;  %v951_v43 = vld [vmem:[#allocation4 + $0x10] sm:$0xff]  }
  0x58   :  { %616 = vmatpush.msra.mxu0 %v870_v13  ;;  %598 = vmatpush.msra.mxu2 %v834_v12  ;;  %v818_v46 = vunpack.c.h.bf16 %v951_v43 }
  0x5a   :  { %617 = vmatpush.msra.mxu0 %v869_v15  ;;  %v833_v15 = vunpack.c.l.bf16 %v955_v9 }
  0x5c   :  { %618 = vmatpush.msra.mxu0 %v866_v16  ;;  %v448_v16 = vadd.f32 %v991_v54, %v447_v7  ;;  %599 = vmatpush.msra.mxu2 %v833_v15 }
  0x5e   :  { %619 = vmatpush.msra.mxu0 %v865_v18  ;;  %v954_v18 = vld [vmem:[#allocation4 + $0x28] sm:$0xff]   ;;  %v1313_v25 = vsel %vm449_vm1, %v991_v54, %v448_v16 }
  0x5f   :  { %v829_v24 = vunpack.c.l.bf16 %v954_v18 }
  0x60   :  { %620 = vmatpush.msra.mxu0 %v862_v19 }
  0x62   :  { %621 = vmatpush.msra.mxu0 %v861_v21  ;;  %v830_v21 = vunpack.c.h.bf16 %v954_v18  ;;  %v987_v18 = vld [vmem:[%s1355_s5] ss:$0 sm:$0xff] }
  0x64   :  { %622 = vmatpush.msra.mxu0 %v858_v22  ;;  %600 = vmatpush.msra.mxu2 %v830_v21 }
  0x66   :  { %623 = vmatpush.msra.mxu0 %v857_v23  ;;  %v893_v23 = vunpack.c.l.bf16 %v969_v17  ;;  %601 = vmatpush.msra.mxu2 %v829_v24 }
  0x68   :  { %624 = vmatpush.msra.mxu0 %v854_v26  ;;  %v968_v26 = vld [vmem:[#allocation6 + $0x20] sm:$0xff]   ;;  %581 = vmatpush.msrb.mxu3 %v893_v23 }
  0x69   :  { %602 = vmatpush.msra.mxu2 %v826_v30 }
  0x6a   :  { %625 = vmatpush.msra.mxu0 %v853_v29  ;;  %v890_v29 = vunpack.c.h.bf16 %v968_v26 }
  0x6b   :  { %603 = vmatpush.msra.mxu2 %v825_v33  ;;  %v977_v33 = vld [vmem:[#allocation7 + $0x30] sm:$0xff]  }
  0x6c   :  { %626 = vmatpush.msra.mxu0 %v850_v32  ;;  %582 = vmatpush.msrb.mxu3 %v890_v29  ;;  %v889_v32 = vunpack.c.l.bf16 %v968_v26 }
  0x6e   :  { %627 = vmatpush.msra.mxu0 %v849_v35  ;;  %v952_v35 = vld [vmem:[#allocation4 + $0x18] sm:$0xff]   ;;  %583 = vmatpush.msrb.mxu3 %v889_v32 }
  0x70   :  { %628 = vmatpush.msra.mxu0 %v846_v38  ;;  %v822_v38 = vunpack.c.h.bf16 %v952_v35  ;;  %584 = vmatpush.msrb.mxu3 %v886_v37  ;;  %v929_v37 = vunpack.c.l.bf16 %v977_v33 }
  0x72   :  { %629 = vmatpush.msra.mxu0 %v845_v41  ;;  %v821_v41 = vunpack.c.l.bf16 %v952_v35  ;;  %604 = vmatpush.msra.mxu2 %v822_v38  ;;  %v930_v35 = vunpack.c.h.bf16 %v977_v33  ;;  %v976_v38 = vld [vmem:[#allocation7 + $0x28] sm:$0xff]  }
  0x73   :  { %585 = vmatpush.msrb.mxu3 %v885_v40  ;;  %v926_v40 = vunpack.c.h.bf16 %v976_v38 }
  0x74   :  { %630 = vmatpush.msra.mxu0 %v842_v44  ;;  %605 = vmatpush.msra.mxu2 %v821_v41 }
  0x76   :  { %631 = vmatpush.msra.mxu0 %v841_v45  ;;  %v882_v45 = vunpack.c.h.bf16 %v966_v42  ;;  %606 = vmatpush.msra.mxu2 %v818_v46  ;;  %v925_v42 = vunpack.c.l.bf16 %v976_v38 }
  0x78   :  { %586 = vmatpush.msrb.mxu3 %v882_v45 }
  0x7a   :  { %587 = vmatpush.msrb.mxu3 %v881_v48  ;;  %v974_v48 = vld [vmem:[#allocation7 + $0x18] sm:$0xff]  }
  0xb1   :  { %v234_v49 = vpop.f32.mrf.mxu0 }
  0xb2   :  { %v235_v50 = vadd.f32 %v234_v49, %v213_v47  ;;  %v817_v49 = vunpack.c.l.bf16 %v951_v43  ;;  %v975_v43 = vld [vmem:[#allocation7 + $0x20] sm:$0xff]  }
  0xb3   :  { %v254_v51 = vpop.f32.mrf.mxu1  ;;  %v922_v45 = vunpack.c.h.bf16 %v975_v43 }
  0xb4   :  { %v1308_v52 = vadd.f32 %v254_v51, %v235_v50  ;;  %v965_v50 = vld [vmem:[#allocation6 + $0x8] sm:$0xff]   ;;  %607 = vmatpush.msra.mxu2 %v817_v49 }
  0xb5   :  { %v950_v51 = vld [vmem:[#allocation4 + $0x8] sm:$0xff]   ;;  %v878_v54 = vunpack.c.h.bf16 %v965_v50  ;;  %v877_v58 = vunpack.c.l.bf16 %v965_v50  ;;  %v918_v50 = vunpack.c.h.bf16 %v974_v48 }
  0xb6   :  { %v297_v55 = vmax.f32 %v1308_v52, 0.0  ;;  %v986_v52 = vld [vmem:[%s1358_s8] ss:$0 sm:$0xff] }
  0xb7   :  { %v274_v56 = vpop.f32.mrf.mxu2  ;;  %588 = vmatpush.msrb.mxu3 %v878_v54  ;;  %v973_v54 = vld [vmem:[#allocation7 + $0x10] sm:$0xff]  }
  0xb8   :  { %v275_v57 = vadd.f32 %v274_v56, %v214_v53  ;;  %383 = vmatmul.f32.vlgmr.msrb.gmra.mxu0 %v297_v55  ;;  %v814_v56 = vunpack.c.h.bf16 %v950_v51 }
  0xb9   :  { %589 = vmatpush.msrb.mxu3 %v877_v58 }
  0xba   :  { %v294_v59 = vpop.f32.mrf.mxu3  ;;  %608 = vmatpush.msra.mxu2 %v814_v56 }
  0xbb   :  { %v295_v60 = vadd.f32 %v294_v59, %v275_v57  ;;  %v813_v59 = vunpack.c.l.bf16 %v950_v51 }
  0xbd   :  { %v298_v61 = vmax.f32 %v295_v60, 0.0  ;;  %v872_v60 = vld [vmem:[#allocation6] sm:$0xff]   ;;  %609 = vmatpush.msra.mxu2 %v813_v59  ;;  %v913_v59 = vunpack.c.l.bf16 %v973_v54 }
  0xbe   :  { %v874_v62 = vunpack.c.h.bf16 %v872_v60  ;;  %v873_v1 = vunpack.c.l.bf16 %v872_v60  ;;  %v972_v60 = vld [vmem:[#allocation7 + $0x8] sm:$0xff]  }
  0xbf   :  { %403 = vmatmul.f32.vlgmr.msrb.gmra.mxu1 %v298_v61  ;;  %v433_v3 = vpop.f32.mrf.mxu2 }
  0xc0   :  { %v438_v4 = vrot.slane %v433_v3, 4  ;;  %632 = vmatmul.f32.vlgmr.msra.gmra.mxu0 %v298_v61  ;;  %v808_v61 = vld [vmem:[#allocation4] sm:$0xff]   ;;  %590 = vmatpush.msrb.mxu3 %v874_v62  ;;  %v910_v62 = vunpack.c.h.bf16 %v972_v60 }
  0xc1   :  { %v810_v63 = vunpack.c.h.bf16 %v808_v61  ;;  %v809_v2 = vunpack.c.l.bf16 %v808_v61 }
  0xc2   :  { %v439_v10 = vadd.f32 %v438_v4, %v433_v3  ;;  %591 = vmatpush.msrb.mxu3 %v873_v1  ;;  %v904_v1 = vld [vmem:[#allocation7] sm:$0xff]  }
  0xc3   :  { %610 = vmatpush.msra.mxu2 %v810_v63 }
  0xc4   :  { %v440_v13 = vrot.slane %v439_v10, 2 }
  0xc5   :  { %611 = vmatpush.msra.mxu2 %v809_v2  ;;  %v906_v2 = vunpack.c.h.bf16 %v904_v1 }
  0xc6   :  { %v441_v19 = vadd.f32 %v440_v13, %v439_v10  ;;  %612 = vmatmul.f32.vlgmr.msra.gmra.mxu2 %v297_v55 }
  0xc8   :  { %v442_v22 = vrot.slane %v441_v19, 1 }
  0xca   :  { %v443_v28 = vadd.f32 %v442_v22, %v441_v19 }
  0xcc   :  { %v451_v31 = vmul.f32 %v1313_v25, %v443_v28  ;;  %v978_v28 = vld [vmem:[#allocation7 + $0x38] sm:$0xff]  }
  0xcd   :  { %v934_v30 = vunpack.c.h.bf16 %v978_v28  ;;  %v933_v32 = vunpack.c.l.bf16 %v978_v28 }
  0xce   :  { %v1316_v36 = vsub.f32 %v433_v3, %v451_v31 }
  0xcf   :  { %709 = vmatpush.msra.mxu1 %v934_v30 }
  0xd0   :  { %v453_v39 = vmul.f32 %v1316_v36, %v1316_v36 }
  0xd1   :  { %710 = vmatpush.msra.mxu1 %v933_v32 }
  0xd2   :  { %v454_v44 = vrot.slane %v453_v39, 4 }
  0xd3   :  { %711 = vmatpush.msra.mxu1 %v930_v35 }
  0xd4   :  { %v455_v47 = vadd.f32 %v454_v44, %v453_v39 }
  0xd5   :  { %712 = vmatpush.msra.mxu1 %v929_v37 }
  0xd6   :  { %v456_v53 = vrot.slane %v455_v47, 2 }
  0xd7   :  { %713 = vmatpush.msra.mxu1 %v926_v40 }
  0xd8   :  { %v457_v57 = vadd.f32 %v456_v53, %v455_v47  ;;  %v921_v47 = vunpack.c.l.bf16 %v975_v43  ;;  %v917_v53 = vunpack.c.l.bf16 %v974_v48 }
  0xd9   :  { %714 = vmatpush.msra.mxu1 %v925_v42 }
  0xda   :  { %v458_v0 = vrot.slane %v457_v57, 1 }
  0xdb   :  { %715 = vmatpush.msra.mxu1 %v922_v45 }
  0xdc   :  { %v459_v3 = vadd.f32 %v458_v0, %v457_v57  ;;  %v914_v57 = vunpack.c.h.bf16 %v973_v54  ;;  %v909_v0 = vunpack.c.l.bf16 %v972_v60 }
  0xdd   :  { %716 = vmatpush.msra.mxu1 %v921_v47 }
  0xde   :  { %v460_v4 = vmul.f32 %v459_v3, %v1313_v25 }
  0xdf   :  { %717 = vmatpush.msra.mxu1 %v918_v50 }
  0xe0   :  { %v461_v5 = vadd.f32 1e-05, %v460_v4  ;;  %v905_v4 = vunpack.c.l.bf16 %v904_v1 }
  0xe1   :  { %718 = vmatpush.msra.mxu1 %v917_v53 }
  0xe2   :  { %992 = vrsqrt.f32 %v461_v5  ;;  %vm468_vm3 = vweird.f32 %v461_v5 }
  0xe3   :  { %719 = vmatpush.msra.mxu1 %v914_v57 }
  0xe5   :  { %720 = vmatpush.msra.mxu1 %v913_v59 }
  0xe7   :  { %721 = vmatpush.msra.mxu1 %v910_v62 }
  0xe8   :  { %v993_v6 = vpop.eup %992 }
  0xe9   :  { %v463_v7 = vmul.f32 %v993_v6, %v461_v5  ;;  %vm469_vm2 = vweird.f32 %v993_v6  ;;  %722 = vmatpush.msra.mxu1 %v909_v0 }
  0xea   :  { %vm470_vm4 = vmor %vm468_vm3, %vm469_vm2 }
  0xeb   :  { %v464_v8 = vmul.f32 %v993_v6, %v463_v7  ;;  %723 = vmatpush.msra.mxu1 %v906_v2 }
  0xed   :  { %v465_v9 = vmul.f32 0.5, %v464_v8  ;;  %724 = vmatpush.msra.mxu1 %v905_v4 }
  0xef   :  { %v466_v10 = vsub.f32 1.5, %v465_v9 }
  0xf1   :  { %v467_v12 = vmul.f32 %v993_v6, %v466_v10 }
  0xf3   :  { %v471_v13 = vsel %vm470_vm4, %v993_v6, %v467_v12 }
  0xf4   :  { %v472_v14 = vmul.f32 %v471_v13, %v436_v11  ;;  %v636_v13 = vld [vmem:[%s1361_s11] sm:$0x1] }
  0xf6   :  { %v473_v15 = vperm.slane %v472_v14, 0 }
  0xf8   :  { %v474_v55 = vmul.f32 %v473_v15, %v1316_v36 }
  0xfa   :  { %v478_v16 = vadd.f32 %v986_v52, %v474_v55 }
  0xfc   :  { %v479_v17 = vmax.f32 %v478_v16, 0.0 }
  0xfe   :  { %592 = vmatmul.f32.vlgmr.msrb.gmra.mxu3 %v479_v17 }
 0x135   :  { %v384_v19 = vpop.f32.mrf.mxu0 }
 0x136   :  { %v385_v20 = vadd.f32 %v987_v18, %v384_v19  ;;  %v989_v19 = vld [vmem:[%s1364_s14] ss:$0 sm:$0xff] }
 0x13c   :  { %v404_v21 = vpop.f32.mrf.mxu1 }
 0x13d   :  { %v405_v22 = vadd.f32 %v404_v21, %v385_v20  ;;  %v633_v27 = vpop.f32.mrf.mxu0 }
 0x13f   :  { %729 = vst [vmem:[%s1365_s15] sm:$0xff] %v405_v22 }
 0x149   :  { %v613_v23 = vpop.f32.mrf.mxu2 }
 0x181   :  { %v593_v24 = vpop.f32.mrf.mxu3 }
 0x182   :  { %v614_v26 = vadd.f32 %v613_v23, %v593_v24 }
 0x184   :  { %v634_v29 = vadd.f32 %v633_v27, %v614_v26 }
 0x186   :  { %v638_v31 = vrot.slane %v634_v29, 4 }
 0x188   :  { %v639_v34 = vadd.f32 %v638_v31, %v634_v29 }
 0x18a   :  { %v640_v36 = vrot.slane %v639_v34, 2 }
 0x18c   :  { %v641_v39 = vadd.f32 %v640_v36, %v639_v34 }
 0x18e   :  { %v642_v41 = vrot.slane %v641_v39, 1 }
 0x190   :  { %v643_v44 = vadd.f32 %v642_v41, %v641_v39 }
 0x192   :  { %v644_v46 = vmul.f32 %v643_v44, %v1313_v25 }
 0x194   :  { %v645_v49 = vsub.f32 %v634_v29, %v644_v46 }
 0x196   :  { %v646_v51 = vmul.f32 %v645_v49, %v645_v49 }
 0x198   :  { %v647_v56 = vrot.slane %v646_v51, 4 }
 0x19a   :  { %v648_v58 = vadd.f32 %v647_v56, %v646_v51 }
 0x19c   :  { %v649_v61 = vrot.slane %v648_v58, 2 }
 0x19e   :  { %v650_v63 = vadd.f32 %v649_v61, %v648_v58 }
 0x1a0   :  { %v651_v3 = vrot.slane %v650_v63, 1 }
 0x1a2   :  { %v652_v5 = vadd.f32 %v651_v3, %v650_v63 }
 0x1a4   :  { %v653_v6 = vmul.f32 %v652_v5, %v1313_v25  ;;  %v988_v25 = vld [vmem:[%s1362_s12] ss:$0 sm:$0xff] }
 0x1a6   :  { %v654_v7 = vadd.f32 1e-05, %v653_v6 }
 0x1a8   :  { %994 = vrsqrt.f32 %v654_v7  ;;  %vm661_vm6 = vweird.f32 %v654_v7 }
 0x1ae   :  { %v995_v8 = vpop.eup %994 }
 0x1af   :  { %v656_v9 = vmul.f32 %v995_v8, %v654_v7  ;;  %vm662_vm5 = vweird.f32 %v995_v8 }
 0x1b0   :  { %vm663_vm7 = vmor %vm661_vm6, %vm662_vm5 }
 0x1b1   :  { %v657_v10 = vmul.f32 %v995_v8, %v656_v9 }
 0x1b3   :  { %v658_v11 = vmul.f32 0.5, %v657_v10 }
 0x1b5   :  { %v659_v12 = vsub.f32 1.5, %v658_v11 }
 0x1b7   :  { %v660_v14 = vmul.f32 %v995_v8, %v659_v12 }
 0x1b9   :  { %v664_v15 = vsel %vm663_vm7, %v995_v8, %v660_v14 }
 0x1ba   :  { %v665_v52 = vmul.f32 %v664_v15, %v636_v13 }
 0x1bc   :  { %v666_v55 = vperm.slane %v665_v52, 0 }
 0x1be   :  { %v667_v16 = vmul.f32 %v666_v55, %v645_v49 }
 0x1c0   :  { %v671_v17 = vadd.f32 %v988_v25, %v667_v16 }
 0x1c2   :  { %v672_v18 = vmax.f32 %v671_v17, 0.0 }
 0x1c4   :  { %725 = vmatmul.f32.vlgmr.msra.gmra.mxu1 %v672_v18 }
 0x241   :  { %v726_v20 = vpop.f32.mrf.mxu1 }
 0x242   :  { %v727_v21 = vadd.f32 %v989_v19, %v726_v20 }
 0x244   :  { %730 = vst [vmem:[%s1365_s15 + $0x8] sm:$0xff] %v727_v21 }
 0x245   :  { %735 = vsyncpa [#allocation3], 1 }
 0x246   :  { %736 = vsyncpa [#allocation5], 1 }
 0x247   :  { %737 = vsyncpa [#allocation8], 1 }

</bundles_post_ra>
